<compile_context>
chip_gen: v7x
topology: tpu7x:2x2x1
jax: 0.10.0
libtpu: 0.0.40
codegen_flags: <defaults>
</compile_context>

<pallas_src>
import jax
import jax.numpy as jnp
from jax.experimental import pallas as pl
from jax.experimental.pallas import tpu as pltpu


def rnn_kernel(x_ref, w_ih_ref, w_hh_ref, b_rnn_ref, w_fc_ref, b_fc_ref,
               out_ref, h_ref):
    # x_ref     : (Tt, Bt, Dp)  time-major block of the input
    # w_ih_ref  : (Dp, Hp)      pre-transposed input->hidden weights
    # w_hh_ref  : (Hp, Hp)      pre-transposed hidden->hidden weights
    # b_rnn_ref : (1, Hp)       combined b_ih + b_hh
    # w_fc_ref  : (Hp, Op)      pre-transposed fc weights
    # b_fc_ref  : (1, Op)
    # out_ref   : (Bt, Op)      final logits (written only on the last t block)
    # h_ref     : (Bt, Hp)      VMEM scratch carrying h across the time grid
    t_blk = pl.program_id(1)

    @pl.when(t_blk == 0)
    def _init():
        h_ref[...] = jnp.zeros_like(h_ref)

    Tt, Bt, _ = x_ref.shape

    # Hoisted, non-recurrent input projection for the whole time block:
    # one large MXU matmul instead of Tt tiny ones inside the serial loop.
    x_blk = x_ref[...].reshape(Tt * Bt, -1)                    # (Tt*Bt, Dp)
    pre = (jnp.dot(x_blk, w_ih_ref[...],
                   preferred_element_type=jnp.float32)
           + b_rnn_ref[...])                                   # (Tt*Bt, Hp)

    w_hh = w_hh_ref[...]
    h = h_ref[...]
    # Static, fully-unrolled recurrence (Tt is a small compile-time constant);
    # only h @ W_hh + tanh remains on the serial critical path.
    for t in range(Tt):
        h = jnp.tanh(pre[t * Bt:(t + 1) * Bt, :]
                     + jnp.dot(h, w_hh, preferred_element_type=jnp.float32))
    h_ref[...] = h

    @pl.when(t_blk == pl.num_programs(1) - 1)
    def _finalize():
        out_ref[...] = (jnp.dot(h, w_fc_ref[...],
                                preferred_element_type=jnp.float32)
                        + b_fc_ref[...])


def _round_up(n, m):
    return ((n + m - 1) // m) * m


def _pick_time_block(T, cap=8):
    # Largest block size <= cap that divides T (time cannot be zero-padded).
    for tt in range(min(T, cap), 0, -1):
        if T % tt == 0:
            return tt
    return 1


def rnn_model_forward(x, w_ih, w_hh, b_ih, b_hh, w_fc, b_fc):
    """x: (B, T, D) float32 (batch_first). Returns (B, O) float32."""
    B, T, D = x.shape
    H = w_hh.shape[0]
    O = w_fc.shape[0]

    # vreg-friendly padding: batch -> sublanes (8), feature dims -> lanes (128).
    Bp = max(8, _round_up(B, 8))
    if Bp > 128:
        Bp = _round_up(Bp, 128)
        Bt = 128
    else:
        Bt = Bp
    Dp = _round_up(D, 128)
    Hp = _round_up(H, 128)
    Op = _round_up(O, 128)
    Tt = _pick_time_block(T)

    # Wrapper-side layout plumbing (fused by XLA): time-major input, weights
    # pre-transposed to (in, out), biases made 2-D, all zero-padded. Zero
    # padding keeps padded hidden units at exactly 0 through the recurrence.
    x_tm = jnp.transpose(x, (1, 0, 2)).astype(jnp.float32)           # (T, B, D)
    x_p = jnp.zeros((T, Bp, Dp), jnp.float32).at[:, :B, :D].set(x_tm)
    w_ih_p = jnp.zeros((Dp, Hp), jnp.float32).at[:D, :H].set(w_ih.T)
    w_hh_p = jnp.zeros((Hp, Hp), jnp.float32).at[:H, :H].set(w_hh.T)
    b_rnn_p = jnp.zeros((1, Hp), jnp.float32).at[0, :H].set(b_ih + b_hh)
    w_fc_p = jnp.zeros((Hp, Op), jnp.float32).at[:H, :O].set(w_fc.T)
    b_fc_p = jnp.zeros((1, Op), jnp.float32).at[0, :O].set(b_fc)

    grid = (Bp // Bt, T // Tt)   # (parallel batch shards, sequential time)

    flops = T * 2 * Bp * Hp * (Dp + Hp) + 2 * Bp * Hp * Op
    bytes_accessed = 4 * (T * Bp * Dp + Dp * Hp + Hp * Hp + Hp * Op
                          + Bp * Op + 2 * Hp + 2 * Op)
    cost = pl.CostEstimate(flops=flops,
                           transcendentals=T * Bp * Hp,
                           bytes_accessed=bytes_accessed)

    out_p = pl.pallas_call(
        rnn_kernel,
        out_shape=jax.ShapeDtypeStruct((Bp, Op), jnp.float32),
        grid_spec=pltpu.PrefetchScalarGridSpec(
            num_scalar_prefetch=0,
            grid=grid,
            in_specs=[
                pl.BlockSpec((Tt, Bt, Dp), lambda b, t: (t, b, 0)),  # streamed x
                pl.BlockSpec((Dp, Hp), lambda b, t: (0, 0)),          # resident W_ih^T
                pl.BlockSpec((Hp, Hp), lambda b, t: (0, 0)),          # resident W_hh^T
                pl.BlockSpec((1, Hp), lambda b, t: (0, 0)),           # b_ih + b_hh
                pl.BlockSpec((Hp, Op), lambda b, t: (0, 0)),          # resident W_fc^T
                pl.BlockSpec((1, Op), lambda b, t: (0, 0)),           # b_fc
            ],
            out_specs=pl.BlockSpec((Bt, Op), lambda b, t: (b, 0)),
            scratch_shapes=[pltpu.VMEM((Bt, Hp), jnp.float32)],       # hidden state
        ),
        compiler_params=pltpu.CompilerParams(
            dimension_semantics=("parallel", "arbitrary")),
        cost_estimate=cost,
    )(x_p, w_ih_p, w_hh_p, b_rnn_p, w_fc_p, b_fc_p)

    return out_p[:B, :O]


def rnn_model_reference(x, w_ih, w_hh, b_ih, b_hh, w_fc, b_fc):
    """Pure-JAX reference matching torch nn.RNN(batch_first=True) + Linear."""
    B, T, D = x.shape
    H = w_hh.shape[0]
    h = jnp.zeros((B, H), jnp.float32)
    for t in range(T):
        h = jnp.tanh(x[:, t, :] @ w_ih.T + b_ih + h @ w_hh.T + b_hh)
    return h @ w_fc.T + b_fc


if __name__ == "__main__":
    # Small shapes consistent with the module: batch=2, seq=8, input=16,
    # hidden=32, output=8.
    B, T, D, H, O = 2, 8, 16, 32, 8

    key = jax.random.PRNGKey(0)
    kx, k1, k2, k3, k4, k5, k6 = jax.random.split(key, 7)

    # Deterministic PyTorch-style init: U(-1/sqrt(H), 1/sqrt(H)).
    s = 1.0 / jnp.sqrt(jnp.float32(H))
    x    = jax.random.normal(kx, (B, T, D), jnp.float32)
    w_ih = jax.random.uniform(k1, (H, D), jnp.float32, -s, s)
    w_hh = jax.random.uniform(k2, (H, H), jnp.float32, -s, s)
    b_ih = jax.random.uniform(k3, (H,),   jnp.float32, -s, s)
    b_hh = jax.random.uniform(k4, (H,),   jnp.float32, -s, s)
    w_fc = jax.random.uniform(k5, (O, H), jnp.float32, -s, s)
    b_fc = jax.random.uniform(k6, (O,),   jnp.float32, -s, s)

    out = rnn_model_forward(x, w_ih, w_hh, b_ih, b_hh, w_fc, b_fc)
    out = jax.block_until_ready(out)

    ref = rnn_model_reference(x, w_ih, w_hh, b_ih, b_hh, w_fc, b_fc)
    assert out.shape == (B, O)
    assert jnp.allclose(out, ref, atol=2e-5, rtol=2e-5), "mismatch vs reference"

    print("KERNEL_OK")
</pallas_src>

<mosaic_0001>
module attributes {stable_mosaic.version = 11 : i64} {
  func.func @rnn_kernel(%arg0: i32, %arg1: i32, %arg2: memref<8x8x128xf32, #tpu.memory_space<vmem>>, %arg3: memref<128x128xf32, #tpu.memory_space<vmem>>, %arg4: memref<128x128xf32, #tpu.memory_space<vmem>>, %arg5: memref<1x128xf32, #tpu.memory_space<vmem>>, %arg6: memref<128x128xf32, #tpu.memory_space<vmem>>, %arg7: memref<1x128xf32, #tpu.memory_space<vmem>>, %arg8: memref<8x128xf32, #tpu.memory_space<vmem>>, %arg9: memref<8x128xf32, #tpu.memory_space<vmem>>) attributes {dimension_semantics = [#tpu.dimension_semantics<parallel>, #tpu.dimension_semantics<arbitrary>], iteration_bounds = array<i64: 1, 1>, scalar_prefetch = 0 : i64, scratch_operands = 1 : i64, tpu.core_type = #tpu.core_type<tc>, window_params = [{transform_indices = @transform_0, window_bounds = array<i64: 8, 8, 128>}, {pipeline_mode = #tpu.pipeline_mode<synchronous>, transform_indices = @transform_1, window_bounds = array<i64: 128, 128>}, {pipeline_mode = #tpu.pipeline_mode<synchronous>, transform_indices = @transform_2, window_bounds = array<i64: 128, 128>}, {pipeline_mode = #tpu.pipeline_mode<synchronous>, transform_indices = @transform_3, window_bounds = array<i64: 1, 128>}, {pipeline_mode = #tpu.pipeline_mode<synchronous>, transform_indices = @transform_4, window_bounds = array<i64: 128, 128>}, {pipeline_mode = #tpu.pipeline_mode<synchronous>, transform_indices = @transform_5, window_bounds = array<i64: 1, 128>}, {transform_indices = @transform_6, window_bounds = array<i64: 8, 128>}]} {
    %c0_i32 = arith.constant 0 : i32
    %0 = arith.cmpi eq, %arg1, %c0_i32 : i32
    %1 = arith.extui %0 : i1 to i32
    %c0_i32_0 = arith.constant 0 : i32
    %2 = arith.cmpi ne, %1, %c0_i32_0 : i32
    scf.if %2 {
      %cst_23 = arith.constant 0.000000e+00 : f32
      %48 = vector.broadcast %cst_23 : f32 to vector<8x128xf32>
      %c0_24 = arith.constant 0 : index
      %c0_25 = arith.constant 0 : index
      %49 = vector.load %arg9[%c0_24, %c0_25] : memref<8x128xf32, #tpu.memory_space<vmem>>, vector<8x128xf32>
      tpu.vector_store %arg9[%c0_24, %c0_25], %48 {strides = array<i32>} : memref<8x128xf32, #tpu.memory_space<vmem>>, vector<8x128xf32>,
    } else {
    }
    %c0 = arith.constant 0 : index
    %c0_1 = arith.constant 0 : index
    %c0_2 = arith.constant 0 : index
    %3 = vector.load %arg2[%c0, %c0_1, %c0_2] : memref<8x8x128xf32, #tpu.memory_space<vmem>>, vector<8x8x128xf32>
    %4 = vector.shape_cast %3 : vector<8x8x128xf32> to vector<64x128xf32>
    %c0_3 = arith.constant 0 : index
    %c0_4 = arith.constant 0 : index
    %5 = vector.load %arg3[%c0_3, %c0_4] : memref<128x128xf32, #tpu.memory_space<vmem>>, vector<128x128xf32>
    %cst = arith.constant dense<0.000000e+00> : vector<64x128xf32>
    %6 = tpu.matmul %4, %5, %cst {dimension_numbers = #tpu.dot_dimension_numbers<[1], [0], [0], [1], [0, 0, 1, 1], [], []>} : vector<64x128xf32>, vector<128x128xf32>, vector<64x128xf32> -> vector<64x128xf32>
    %c0_5 = arith.constant 0 : index
    %c0_6 = arith.constant 0 : index
    %7 = vector.load %arg5[%c0_5, %c0_6] : memref<1x128xf32, #tpu.memory_space<vmem>>, vector<1x128xf32>
    %8 = vector.broadcast %7 : vector<1x128xf32> to vector<64x128xf32>
    %9 = arith.addf %6, %8 : vector<64x128xf32>
    %c0_7 = arith.constant 0 : index
    %c0_8 = arith.constant 0 : index
    %10 = vector.load %arg4[%c0_7, %c0_8] : memref<128x128xf32, #tpu.memory_space<vmem>>, vector<128x128xf32>
    %c0_9 = arith.constant 0 : index
    %c0_10 = arith.constant 0 : index
    %11 = vector.load %arg9[%c0_9, %c0_10] : memref<8x128xf32, #tpu.memory_space<vmem>>, vector<8x128xf32>
    %12 = vector.extract_strided_slice %9 {offsets = [0, 0], sizes = [8, 128], strides = [1, 1]} : vector<64x128xf32> to vector<8x128xf32>
    %cst_11 = arith.constant dense<0.000000e+00> : vector<8x128xf32>
    %13 = tpu.matmul %11, %10, %cst_11 {dimension_numbers = #tpu.dot_dimension_numbers<[1], [0], [0], [1], [0, 0, 1, 1], [], []>} : vector<8x128xf32>, vector<128x128xf32>, vector<8x128xf32> -> vector<8x128xf32>
    %14 = arith.addf %12, %13 : vector<8x128xf32>
    %15 = math.tanh %14 : vector<8x128xf32>
    %16 = vector.extract_strided_slice %9 {offsets = [8, 0], sizes = [8, 128], strides = [1, 1]} : vector<64x128xf32> to vector<8x128xf32>
    %cst_12 = arith.constant dense<0.000000e+00> : vector<8x128xf32>
    %17 = tpu.matmul %15, %10, %cst_12 {dimension_numbers = #tpu.dot_dimension_numbers<[1], [0], [0], [1], [0, 0, 1, 1], [], []>} : vector<8x128xf32>, vector<128x128xf32>, vector<8x128xf32> -> vector<8x128xf32>
    %18 = arith.addf %16, %17 : vector<8x128xf32>
    %19 = math.tanh %18 : vector<8x128xf32>
    %20 = vector.extract_strided_slice %9 {offsets = [16, 0], sizes = [8, 128], strides = [1, 1]} : vector<64x128xf32> to vector<8x128xf32>
    %cst_13 = arith.constant dense<0.000000e+00> : vector<8x128xf32>
    %21 = tpu.matmul %19, %10, %cst_13 {dimension_numbers = #tpu.dot_dimension_numbers<[1], [0], [0], [1], [0, 0, 1, 1], [], []>} : vector<8x128xf32>, vector<128x128xf32>, vector<8x128xf32> -> vector<8x128xf32>
    %22 = arith.addf %20, %21 : vector<8x128xf32>
    %23 = math.tanh %22 : vector<8x128xf32>
    %24 = vector.extract_strided_slice %9 {offsets = [24, 0], sizes = [8, 128], strides = [1, 1]} : vector<64x128xf32> to vector<8x128xf32>
    %cst_14 = arith.constant dense<0.000000e+00> : vector<8x128xf32>
    %25 = tpu.matmul %23, %10, %cst_14 {dimension_numbers = #tpu.dot_dimension_numbers<[1], [0], [0], [1], [0, 0, 1, 1], [], []>} : vector<8x128xf32>, vector<128x128xf32>, vector<8x128xf32> -> vector<8x128xf32>
    %26 = arith.addf %24, %25 : vector<8x128xf32>
    %27 = math.tanh %26 : vector<8x128xf32>
    %28 = vector.extract_strided_slice %9 {offsets = [32, 0], sizes = [8, 128], strides = [1, 1]} : vector<64x128xf32> to vector<8x128xf32>
    %cst_15 = arith.constant dense<0.000000e+00> : vector<8x128xf32>
    %29 = tpu.matmul %27, %10, %cst_15 {dimension_numbers = #tpu.dot_dimension_numbers<[1], [0], [0], [1], [0, 0, 1, 1], [], []>} : vector<8x128xf32>, vector<128x128xf32>, vector<8x128xf32> -> vector<8x128xf32>
    %30 = arith.addf %28, %29 : vector<8x128xf32>
    %31 = math.tanh %30 : vector<8x128xf32>
    %32 = vector.extract_strided_slice %9 {offsets = [40, 0], sizes = [8, 128], strides = [1, 1]} : vector<64x128xf32> to vector<8x128xf32>
    %cst_16 = arith.constant dense<0.000000e+00> : vector<8x128xf32>
    %33 = tpu.matmul %31, %10, %cst_16 {dimension_numbers = #tpu.dot_dimension_numbers<[1], [0], [0], [1], [0, 0, 1, 1], [], []>} : vector<8x128xf32>, vector<128x128xf32>, vector<8x128xf32> -> vector<8x128xf32>
    %34 = arith.addf %32, %33 : vector<8x128xf32>
    %35 = math.tanh %34 : vector<8x128xf32>
    %36 = vector.extract_strided_slice %9 {offsets = [48, 0], sizes = [8, 128], strides = [1, 1]} : vector<64x128xf32> to vector<8x128xf32>
    %cst_17 = arith.constant dense<0.000000e+00> : vector<8x128xf32>
    %37 = tpu.matmul %35, %10, %cst_17 {dimension_numbers = #tpu.dot_dimension_numbers<[1], [0], [0], [1], [0, 0, 1, 1], [], []>} : vector<8x128xf32>, vector<128x128xf32>, vector<8x128xf32> -> vector<8x128xf32>
    %38 = arith.addf %36, %37 : vector<8x128xf32>
    %39 = math.tanh %38 : vector<8x128xf32>
    %40 = vector.extract_strided_slice %9 {offsets = [56, 0], sizes = [8, 128], strides = [1, 1]} : vector<64x128xf32> to vector<8x128xf32>
    %cst_18 = arith.constant dense<0.000000e+00> : vector<8x128xf32>
    %41 = tpu.matmul %39, %10, %cst_18 {dimension_numbers = #tpu.dot_dimension_numbers<[1], [0], [0], [1], [0, 0, 1, 1], [], []>} : vector<8x128xf32>, vector<128x128xf32>, vector<8x128xf32> -> vector<8x128xf32>
    %42 = arith.addf %40, %41 : vector<8x128xf32>
    %43 = math.tanh %42 : vector<8x128xf32>
    %c0_19 = arith.constant 0 : index
    %c0_20 = arith.constant 0 : index
    %44 = vector.load %arg9[%c0_19, %c0_20] : memref<8x128xf32, #tpu.memory_space<vmem>>, vector<8x128xf32>
    tpu.vector_store %arg9[%c0_19, %c0_20], %43 {strides = array<i32>} : memref<8x128xf32, #tpu.memory_space<vmem>>, vector<8x128xf32>,
    %c0_i32_21 = arith.constant 0 : i32
    %45 = arith.cmpi eq, %arg1, %c0_i32_21 : i32
    %46 = arith.extui %45 : i1 to i32
    %c0_i32_22 = arith.constant 0 : i32
    %47 = arith.cmpi ne, %46, %c0_i32_22 : i32
    scf.if %47 {
      %c0_23 = arith.constant 0 : index
      %c0_24 = arith.constant 0 : index
      %48 = vector.load %arg6[%c0_23, %c0_24] : memref<128x128xf32, #tpu.memory_space<vmem>>, vector<128x128xf32>
      %cst_25 = arith.constant dense<0.000000e+00> : vector<8x128xf32>
      %49 = tpu.matmul %43, %48, %cst_25 {dimension_numbers = #tpu.dot_dimension_numbers<[1], [0], [0], [1], [0, 0, 1, 1], [], []>} : vector<8x128xf32>, vector<128x128xf32>, vector<8x128xf32> -> vector<8x128xf32>
      %c0_26 = arith.constant 0 : index
      %c0_27 = arith.constant 0 : index
      %50 = vector.load %arg7[%c0_26, %c0_27] : memref<1x128xf32, #tpu.memory_space<vmem>>, vector<1x128xf32>
      %51 = vector.broadcast %50 : vector<1x128xf32> to vector<8x128xf32>
      %52 = arith.addf %49, %51 : vector<8x128xf32>
      %c0_28 = arith.constant 0 : index
      %c0_29 = arith.constant 0 : index
      %53 = vector.load %arg8[%c0_28, %c0_29] : memref<8x128xf32, #tpu.memory_space<vmem>>, vector<8x128xf32>
      tpu.vector_store %arg8[%c0_28, %c0_29], %52 {strides = array<i32>} : memref<8x128xf32, #tpu.memory_space<vmem>>, vector<8x128xf32>,
    } else {
    }
    return
  }
  func.func @transform_0(%arg0: i32, %arg1: i32) -> (i32, i32, i32) {
    %c0_i32 = arith.constant 0 : i32
    %c0_i32_0 = arith.constant 0 : i32
    return %arg1, %arg0, %c0_i32 : i32, i32, i32
  }
  func.func @transform_1(%arg0: i32, %arg1: i32) -> (i32, i32) {
    %c0_i32 = arith.constant 0 : i32
    %c0_i32_0 = arith.constant 0 : i32
    %c0_i32_1 = arith.constant 0 : i32
    return %c0_i32, %c0_i32_0 : i32, i32
  }
  func.func @transform_2(%arg0: i32, %arg1: i32) -> (i32, i32) {
    %c0_i32 = arith.constant 0 : i32
    %c0_i32_0 = arith.constant 0 : i32
    %c0_i32_1 = arith.constant 0 : i32
    return %c0_i32, %c0_i32_0 : i32, i32
  }
  func.func @transform_3(%arg0: i32, %arg1: i32) -> (i32, i32) {
    %c0_i32 = arith.constant 0 : i32
    %c0_i32_0 = arith.constant 0 : i32
    %c0_i32_1 = arith.constant 0 : i32
    return %c0_i32, %c0_i32_0 : i32, i32
  }
  func.func @transform_4(%arg0: i32, %arg1: i32) -> (i32, i32) {
    %c0_i32 = arith.constant 0 : i32
    %c0_i32_0 = arith.constant 0 : i32
    %c0_i32_1 = arith.constant 0 : i32
    return %c0_i32, %c0_i32_0 : i32, i32
  }
  func.func @transform_5(%arg0: i32, %arg1: i32) -> (i32, i32) {
    %c0_i32 = arith.constant 0 : i32
    %c0_i32_0 = arith.constant 0 : i32
    %c0_i32_1 = arith.constant 0 : i32
    return %c0_i32, %c0_i32_0 : i32, i32
  }
  func.func @transform_6(%arg0: i32, %arg1: i32) -> (i32, i32) {
    %c0_i32 = arith.constant 0 : i32
    %c0_i32_0 = arith.constant 0 : i32
    return %arg0, %c0_i32 : i32, i32
  }
}

</mosaic_0001>

<bundles_post_ra>
// kernel: tpu_custom_call.1
= control target key start
LH: loop header
LB: loop body
LE: loop exit
PB: predicated region body
PF: predicated region fallthrough
CT: control target
= control target key end

     0   :  { %11 = vsyncpa [#allocation4], 0  ;;  %s2188_s0 = inlined_call_operand.hbm [shape: f32[8,8,128], index: 0, kind: input, shape index: {}]   ;;  %s2189_s1 = inlined_call_operand.hbm [shape: f32[128,128], index: 1, kind: input, shape index: {}]   ;;  %s2190_s2 = inlined_call_operand.hbm [shape: f32[128,128], index: 2, kind: input, shape index: {}]   ;;  %s2191_s3 = inlined_call_operand.vmem [shape: f32[1,128], index: 3, kind: input, shape index: {}]   ;;  %s2192_s4 = inlined_call_operand.hbm [shape: f32[128,128], index: 4, kind: input, shape index: {}]   ;;  %s2193_s5 = inlined_call_operand.vmem [shape: f32[1,128], index: 5, kind: input, shape index: {}]   ;;  %s2194_s6 = inlined_call_operand.hbm [shape: f32[8,128], index: 6, kind: output, shape index: {}]  }
   0x1   :  { %12 = vsyncpa [#allocation7], 0 }
   0x2   :  { %13 = vsyncpa [#allocation10], 0 }
   0x3   :  { %14 = vsyncpa [#allocation5], 0  ;;  %s1858_s21 = smov [#allocation6]   ;;  %s1859_s23 = smov [#allocation3]  }
   0x4   :  { %s32_s22 = sshll.u32 %s1858_s21, 4  ;;  %s20_s24 = sshll.u32 %s1859_s23, 4  ;;  %s33_s22 = int_to_ptr.vmem [resolvable:$true] %s32_s22  ;;  %s1903_s24 = int_to_ptr.vmem [resolvable:$true] %s20_s24 }
   0x5   :  { %s1740_s27 = scalar_lea.hbm %s2189_s1, 2048 }
   0x6   :  { %p1741_p0 = scmp.ne.s32.totalorder %s2189_s1, %s1740_s27  ;;  %p1744_p1 = scmp.lt.u32.totalorder %s1740_s27, %s2189_s1 }
   0x8   :  { %p1746_p2 = pnand %p1744_p1, %p1741_p0 }
   0xa   :  { %1749 = shalt.err (!%p1746_p2)
}
   0xb   :  { %s1750_s8 = scalar_lea.vmem %s33_s22, 2048  ;;  %p1755_p4 = scmp.lt.s32.totalorder %s33_s22, %s33_s22 }
   0xc   :  { %p1751_p3 = scmp.ne.s32.totalorder %s33_s22, %s1750_s8  ;;  %p1756_p5 = scmp.lt.s32.totalorder %s1750_s8, %s1750_s8 }
   0xe   :  { %p1757_p6 = por %p1756_p5, %p1755_p4 }
  0x10   :  { %p1758_p7 = pnand %p1757_p6, %p1751_p3 }
  0x12   :  { %1761 = shalt.err (!%p1758_p7)
}
  0x13   :  { %s1860_s9 = smov 128   ;;  %s1861_s10 = smov 8  }
  0x14   :  { %38 = dma.hbm_to_vmem [thread:$0]  %s2189_s1, 2048, %s33_s22, [#allocation7], %s1860_s9, %s1860_s9, %s1861_s10  }
  0x15   :  { %s1762_s15 = scalar_lea.hbm %s2188_s0, 1024 }
  0x16   :  { %p1763_p8 = scmp.ne.s32.totalorder %s2188_s0, %s1762_s15  ;;  %p1766_p9 = scmp.lt.u32.totalorder %s1762_s15, %s2188_s0 }
  0x18   :  { %p1768_p10 = pnand %p1766_p9, %p1763_p8 }
  0x1a   :  { %1771 = shalt.err (!%p1768_p10)
}
  0x1b   :  { %s1772_s20 = scalar_lea.vmem %s1903_s24, 1024  ;;  %p1777_p12 = scmp.lt.s32.totalorder %s1903_s24, %s1903_s24 }
  0x1c   :  { %p1773_p11 = scmp.ne.s32.totalorder %s1903_s24, %s1772_s20  ;;  %p1778_p13 = scmp.lt.s32.totalorder %s1772_s20, %s1772_s20 }
  0x1e   :  { %p1779_p0 = por %p1778_p13, %p1777_p12 }
  0x20   :  { %p1780_p1 = pnand %p1779_p0, %p1773_p11 }
  0x22   :  { %1783 = shalt.err (!%p1780_p1)
}
  0x23   :  { %26 = dma.hbm_to_vmem [thread:$0]  %s2188_s0, 1024, %s1903_s24, [#allocation4], %s1860_s9, %s1860_s9, %s1861_s10  }
  0x24   :  { %s1862_s22 = smov [#allocation8]   ;;  %s1863_s25 = smov [#allocation9]  }
  0x25   :  { %s44_s23 = sshll.u32 %s1862_s22, 4  ;;  %s58_s26 = sshll.u32 %s1863_s25, 4  ;;  %s45_s23 = int_to_ptr.vmem [resolvable:$true] %s44_s23  ;;  %s1940_s26 = int_to_ptr.vmem [resolvable:$true] %s58_s26 }
  0x26   :  { %s1784_s29 = scalar_lea.hbm %s2190_s2, 2048 }
  0x27   :  { %p1785_p2 = scmp.ne.s32.totalorder %s2190_s2, %s1784_s29  ;;  %p1788_p3 = scmp.lt.u32.totalorder %s1784_s29, %s2190_s2 }
  0x29   :  { %p1790_p4 = pnand %p1788_p3, %p1785_p2 }
  0x2b   :  { %1793 = shalt.err (!%p1790_p4)
}
  0x2c   :  { %s1794_s0 = scalar_lea.vmem %s45_s23, 2048  ;;  %p1799_p6 = scmp.lt.s32.totalorder %s45_s23, %s45_s23 }
  0x2d   :  { %p1795_p5 = scmp.ne.s32.totalorder %s45_s23, %s1794_s0  ;;  %p1800_p7 = scmp.lt.s32.totalorder %s1794_s0, %s1794_s0 }
  0x2f   :  { %p1801_p8 = por %p1800_p7, %p1799_p6 }
  0x31   :  { %p1802_p9 = pnand %p1801_p8, %p1795_p5 }
  0x33   :  { %1805 = shalt.err (!%p1802_p9)
}
  0x34   :  { %50 = dma.hbm_to_vmem [thread:$0]  %s2190_s2, 2048, %s45_s23, [#allocation7], %s1860_s9, %s1860_s9, %s1861_s10  }
  0x35   :  { %s1806_s15 = scalar_lea.hbm %s2192_s4, 2048 }
  0x36   :  { %p1807_p10 = scmp.ne.s32.totalorder %s2192_s4, %s1806_s15  ;;  %p1810_p11 = scmp.lt.u32.totalorder %s1806_s15, %s2192_s4 }
  0x38   :  { %p1812_p12 = pnand %p1810_p11, %p1807_p10 }
  0x3a   :  { %1815 = shalt.err (!%p1812_p12)
}
  0x3b   :  { %s1816_s20 = scalar_lea.vmem %s1940_s26, 2048  ;;  %p1821_p0 = scmp.lt.s32.totalorder %s1940_s26, %s1940_s26 }
  0x3c   :  { %p1817_p13 = scmp.ne.s32.totalorder %s1940_s26, %s1816_s20  ;;  %p1822_p1 = scmp.lt.s32.totalorder %s1816_s20, %s1816_s20 }
  0x3e   :  { %p1823_p2 = por %p1822_p1, %p1821_p0 }
  0x40   :  { %p1824_p3 = pnand %p1823_p2, %p1817_p13 }
  0x42   :  { %1827 = shalt.err (!%p1824_p3)
}
  0x43   :  { %64 = dma.hbm_to_vmem [thread:$0]  %s2192_s4, 2048, %s1940_s26, [#allocation10], %s1860_s9, %s1860_s9, %s1861_s10  }
  0x44   :  { %1850 = dma.done.wait [#allocation4], 1024  }
  0x45   :  { %1851 = vsyncadd [#allocation4], 4294966272 }
  0x46   :  { %1852 = dma.done.wait [#allocation7], 4096  }
  0x47   :  { %1853 = vsyncadd [#allocation7], 4294963200 }
  0x48   :  { %1854 = dma.done.wait [#allocation10], 2048  }
  0x49   :  { %1855 = vsyncadd [#allocation10], 4294965248  ;;  %v1864_v0 = vmov 0.0|0.0   ;;  %vm1865_vm0 = vmmov 0   ;;  %v1866_v1 = vmov 0.0   ;;  %v92_v2 = vld [vmem:[#allocation6] sm:$0xff] }
  0x4a   :  { %1498 = vmatprep.subr.bf16.mxu1 %v1864_v0  ;;  %1183 = vmatprep.mubr.msk.f32.mxu1 %vm1865_vm0, %v1866_v1  ;;  %v93_v3 = vld [vmem:[#allocation6 + $0x8] sm:$0xff]  ;;  %v220_v4 = vld [vmem:[#allocation8] sm:$0xff]  ;;  %v94_v7 = vld [vmem:[#allocation6 + $0x10] sm:$0xff]  ;;  %s1867_s21 = smov [#allocation11]  }
  0x4b   :  { %v1466_v5 = vpack.c.bf16 %v93_v3, %v92_v2  ;;  %v221_v6 = vld [vmem:[#allocation8 + $0x8] sm:$0xff]  ;;  %v95_v8 = vld [vmem:[#allocation6 + $0x18] sm:$0xff]  ;;  %v222_v11 = vld [vmem:[#allocation8 + $0x10] sm:$0xff]  ;;  %s917_s22 = sshll.u32 %s1867_s21, 4  ;;  %s918_s22 = int_to_ptr.vmem [resolvable:$true] %s917_s22 }
  0x4c   :  { %v1980_v9 = vpack.c.bf16 %v221_v6, %v220_v4  ;;  %v1470_v10 = vpack.c.bf16 %v95_v8, %v94_v7  ;;  %v223_v12 = vld [vmem:[#allocation8 + $0x18] sm:$0xff]  ;;  %v96_v13 = vld [vmem:[#allocation6 + $0x20] sm:$0xff]  ;;  %v97_v14 = vld [vmem:[#allocation6 + $0x28] sm:$0xff]  ;;  %s1828_s23 = scalar_lea.vmem %s918_s22, 128  ;;  %p1833_p5 = scmp.lt.s32.totalorder %s918_s22, %s918_s22 }
  0x4d   :  { %1467 = vmatprep.subr.bf16.mxu0 %v1466_v5  ;;  %v1983_v15 = vpack.c.bf16 %v223_v12, %v222_v11  ;;  %v1474_v16 = vpack.c.bf16 %v97_v14, %v96_v13  ;;  %v224_v17 = vld [vmem:[#allocation8 + $0x20] sm:$0xff]  ;;  %v225_v18 = vld [vmem:[#allocation8 + $0x28] sm:$0xff]  ;;  %v98_v19 = vld [vmem:[#allocation6 + $0x30] sm:$0xff]  ;;  %p1829_p4 = scmp.ne.s32.totalorder %s918_s22, %s1828_s23  ;;  %p1834_p6 = scmp.lt.s32.totalorder %s1828_s23, %s1828_s23 }
  0x4e   :  { %1469 = vmatpush3.bf16.msra.mxu0 %v1466_v5  ;;  %1500 = vmatpush3.bf16.msra.mxu1 %v1980_v9  ;;  %v99_v20 = vld [vmem:[#allocation6 + $0x38] sm:$0xff]  ;;  %v1987_v21 = vpack.c.bf16 %v225_v18, %v224_v17  ;;  %v226_v23 = vld [vmem:[#allocation8 + $0x30] sm:$0xff]  ;;  %v100_v25 = vld [vmem:[#allocation6 + $0x40] sm:$0xff] }
  0x4f   :  { %1471 = vmatprep.subr.bf16.mxu0 %v1470_v10  ;;  %1501 = vmatprep.subr.bf16.mxu1 %v1864_v0  ;;  %v1478_v22 = vpack.c.bf16 %v99_v20, %v98_v19  ;;  %v227_v24 = vld [vmem:[#allocation8 + $0x38] sm:$0xff]  ;;  %v101_v26 = vld [vmem:[#allocation6 + $0x48] sm:$0xff]  ;;  %v84_v27 = vld [vmem:[#allocation3] sm:$0xff]  ;;  %p1835_p7 = por %p1834_p6, %p1833_p5 }
  0x50   :  { %1139 = vmatprep.mubr.f32.mxu0 %v84_v27  ;;  %v1991_v28 = vpack.c.bf16 %v227_v24, %v226_v23  ;;  %v1482_v29 = vpack.c.bf16 %v101_v26, %v100_v25  ;;  %v228_v30 = vld [vmem:[#allocation8 + $0x40] sm:$0xff]  ;;  %v229_v31 = vld [vmem:[#allocation8 + $0x48] sm:$0xff]  ;;  %v102_v32 = vld [vmem:[#allocation6 + $0x50] sm:$0xff] }
  0x51   :  { %v103_v33 = vld [vmem:[#allocation6 + $0x58] sm:$0xff]  ;;  %v1995_v34 = vpack.c.bf16 %v229_v31, %v228_v30  ;;  %v230_v36 = vld [vmem:[#allocation8 + $0x50] sm:$0xff]  ;;  %v104_v38 = vld [vmem:[#allocation6 + $0x60] sm:$0xff]  ;;  %p1836_p8 = pnand %p1835_p7, %p1829_p4 }
  0x52   :  { %1473 = vmatpush3.bf16.msra.mxu0 %v1470_v10  ;;  %1503 = vmatpush3.bf16.msra.mxu1 %v1983_v15  ;;  %v1486_v35 = vpack.c.bf16 %v103_v33, %v102_v32  ;;  %v231_v37 = vld [vmem:[#allocation8 + $0x58] sm:$0xff]  ;;  %v105_v39 = vld [vmem:[#allocation6 + $0x68] sm:$0xff]  ;;  %v232_v42 = vld [vmem:[#allocation8 + $0x60] sm:$0xff] }
  0x53   :  { %1475 = vmatprep.subr.bf16.mxu0 %v1474_v16  ;;  %1504 = vmatprep.subr.bf16.mxu1 %v1864_v0  ;;  %v1999_v40 = vpack.c.bf16 %v231_v37, %v230_v36  ;;  %v1490_v41 = vpack.c.bf16 %v105_v39, %v104_v38  ;;  %v233_v43 = vld [vmem:[#allocation8 + $0x68] sm:$0xff]  ;;  %v106_v44 = vld [vmem:[#allocation6 + $0x70] sm:$0xff]  ;;  %v107_v45 = vld [vmem:[#allocation6 + $0x78] sm:$0xff] }
  0x54   :  { %v2003_v46 = vpack.c.bf16 %v233_v43, %v232_v42  ;;  %v1494_v47 = vpack.c.bf16 %v107_v45, %v106_v44  ;;  %v234_v48 = vld [vmem:[#allocation8 + $0x70] sm:$0xff]  ;;  %v235_v49 = vld [vmem:[#allocation8 + $0x78] sm:$0xff]  ;;  %v85_v51 = vld [vmem:[#allocation3 + $0x8] sm:$0xff] }
  0x55   :  { %v2007_v50 = vpack.c.bf16 %v235_v49, %v234_v48  ;;  %v86_v52 = vld [vmem:[#allocation3 + $0x10] sm:$0xff]  ;;  %v87_v53 = vld [vmem:[#allocation3 + $0x18] sm:$0xff]  ;;  %v88_v54 = vld [vmem:[#allocation3 + $0x20] sm:$0xff] }
  0x56   :  { %1477 = vmatpush3.bf16.msra.mxu0 %v1474_v16  ;;  %1506 = vmatpush3.bf16.msra.mxu1 %v1987_v21  ;;  %v89_v55 = vld [vmem:[#allocation3 + $0x28] sm:$0xff]  ;;  %v90_v56 = vld [vmem:[#allocation3 + $0x30] sm:$0xff]  ;;  %v91_v57 = vld [vmem:[#allocation3 + $0x38] sm:$0xff] }
  0x57   :  { %1479 = vmatprep.subr.bf16.mxu0 %v1478_v22  ;;  %1507 = vmatprep.subr.bf16.mxu1 %v1864_v0  ;;  %v2053_v58 = vld [vmem:[%s2191_s3] ss:$0 sm:$0xff]  ;;  %v818_v36 = vld [vmem:[#allocation9 + $0x8] sm:$0xff]  ;;  %v819_v37 = vld [vmem:[#allocation9 + $0x10] sm:$0xff] }
  0x58   :  { %v820_v39 = vld [vmem:[#allocation9 + $0x18] sm:$0xff]  ;;  %v822_v42 = vld [vmem:[#allocation9 + $0x28] sm:$0xff]  ;;  %v823_v44 = vld [vmem:[#allocation9 + $0x30] sm:$0xff] }
  0x59   :  { %v824_v45 = vld [vmem:[#allocation9 + $0x38] sm:$0xff] }
  0x5a   :  { %1481 = vmatpush3.bf16.msra.mxu0 %v1478_v22  ;;  %1509 = vmatpush3.bf16.msra.mxu1 %v1991_v28 }
  0x5b   :  { %1483 = vmatprep.subr.bf16.mxu0 %v1482_v29  ;;  %1510 = vmatprep.subr.bf16.mxu1 %v1864_v0 }
  0x5e   :  { %1485 = vmatpush3.bf16.msra.mxu0 %v1482_v29  ;;  %1512 = vmatpush3.bf16.msra.mxu1 %v1995_v34 }
  0x5f   :  { %1487 = vmatprep.subr.bf16.mxu0 %v1486_v35  ;;  %1513 = vmatprep.subr.bf16.mxu1 %v1864_v0 }
  0x62   :  { %1489 = vmatpush3.bf16.msra.mxu0 %v1486_v35  ;;  %1515 = vmatpush3.bf16.msra.mxu1 %v1999_v40  ;;  %v817_v35 = vld [vmem:[#allocation9] sm:$0xff] }
  0x63   :  { %1491 = vmatprep.subr.bf16.mxu0 %v1490_v41  ;;  %1516 = vmatprep.subr.bf16.mxu1 %v1864_v0  ;;  %v1691_v38 = vpack.c.bf16 %v818_v36, %v817_v35 }
  0x66   :  { %1493 = vmatpush3.bf16.msra.mxu0 %v1490_v41  ;;  %1518 = vmatpush3.bf16.msra.mxu1 %v2003_v46  ;;  %v821_v41 = vld [vmem:[#allocation9 + $0x20] sm:$0xff] }
  0x67   :  { %1495 = vmatprep.subr.bf16.mxu0 %v1494_v47  ;;  %1519 = vmatprep.subr.bf16.mxu1 %v1864_v0  ;;  %v1697_v43 = vpack.c.bf16 %v822_v42, %v821_v41 }
  0x6a   :  { %1497 = vmatpush3.bf16.msra.mxu0 %v1494_v47  ;;  %1521 = vmatpush3.bf16.msra.mxu1 %v2007_v50  ;;  %v826_v47 = vld [vmem:[#allocation9 + $0x48] sm:$0xff] }
  0x6b   :  { %1522 = vmatprep.subr.bf16.mxu0 %v1864_v0  ;;  %1546 = vmatprep.subr.bf16.mxu1 %v1864_v0 }
  0x6d   :  { %1140 = vmatmul.mubr.f32.vlgmr.msra.gmra.mrb[0].mxu0 %v85_v51  ;;  %1184 = vmatmul.mubr.f32.vlgmr.msra.gmra.mrb[0].mxu1 %v1866_v1 }
  0x6e   :  { %1524 = vmatpush3.bf16.msra.mxu0 %v1980_v9  ;;  %1548 = vmatpush3.bf16.msra.mxu1 %v1980_v9 }
  0x6f   :  { %1525 = vmatprep.subr.bf16.mxu0 %v1864_v0  ;;  %1549 = vmatprep.subr.bf16.mxu1 %v1864_v0 }
  0x70   :  { %1253 = vmatprep.mubr.msk.f32.mxu1 %vm1865_vm0, %v1866_v1  ;;  %1142 = vmatprep.mubr.f32.mxu0 %v86_v52 }
  0x71   :  { %1143 = vmatmul.mubr.f32.gmra.mrb[2].mxu0 %v87_v53 }
  0x72   :  { %1527 = vmatpush3.bf16.msra.mxu0 %v1983_v15  ;;  %1551 = vmatpush3.bf16.msra.mxu1 %v1983_v15 }
  0x73   :  { %1528 = vmatprep.subr.bf16.mxu0 %v1864_v0  ;;  %1552 = vmatprep.subr.bf16.mxu1 %v1864_v0 }
  0x74   :  { %1145 = vmatprep.mubr.f32.mxu0 %v88_v54  ;;  %v827_v54 = vld [vmem:[#allocation9 + $0x50] sm:$0xff] }
  0x75   :  { %1146 = vmatmul.mubr.f32.gmra.mrb[4].mxu0 %v89_v55  ;;  %v828_v55 = vld [vmem:[#allocation9 + $0x58] sm:$0xff] }
  0x76   :  { %1530 = vmatpush3.bf16.msra.mxu0 %v1987_v21  ;;  %1554 = vmatpush3.bf16.msra.mxu1 %v1987_v21 }
  0x77   :  { %1531 = vmatprep.subr.bf16.mxu0 %v1864_v0  ;;  %1555 = vmatprep.subr.bf16.mxu1 %v1864_v0 }
  0x78   :  { %1148 = vmatprep.mubr.f32.mxu0 %v90_v56  ;;  %v1706_v56 = vpack.c.bf16 %v828_v55, %v827_v54 }
  0x79   :  { %1149 = vmatmul.mubr.f32.gmra.mrb[6].mxu0 %v91_v57  ;;  %v829_v57 = vld [vmem:[#allocation9 + $0x60] sm:$0xff] }
  0x7a   :  { %1533 = vmatpush3.bf16.msra.mxu0 %v1991_v28  ;;  %1557 = vmatpush3.bf16.msra.mxu1 %v1991_v28 }
  0x7b   :  { %1534 = vmatprep.subr.bf16.mxu0 %v1864_v0  ;;  %1558 = vmatprep.subr.bf16.mxu1 %v1864_v0 }
  0x7c   :  { %1218 = vmatprep.mubr.msk.f32.mxu0 %vm1865_vm0, %v1866_v1 }
  0x7e   :  { %1536 = vmatpush3.bf16.msra.mxu0 %v1995_v34  ;;  %1560 = vmatpush3.bf16.msra.mxu1 %v1995_v34 }
  0x7f   :  { %1537 = vmatprep.subr.bf16.mxu0 %v1864_v0  ;;  %1561 = vmatprep.subr.bf16.mxu1 %v1864_v0 }
  0x82   :  { %1539 = vmatpush3.bf16.msra.mxu0 %v1999_v40  ;;  %1563 = vmatpush3.bf16.msra.mxu1 %v1999_v40 }
  0x83   :  { %1540 = vmatprep.subr.bf16.mxu0 %v1864_v0  ;;  %1564 = vmatprep.subr.bf16.mxu1 %v1864_v0 }
  0x86   :  { %1542 = vmatpush3.bf16.msra.mxu0 %v2003_v46  ;;  %1566 = vmatpush3.bf16.msra.mxu1 %v2003_v46 }
  0x87   :  { %1543 = vmatprep.subr.bf16.mxu0 %v1864_v0  ;;  %1567 = vmatprep.subr.bf16.mxu1 %v1864_v0 }
  0x8a   :  { %1545 = vmatpush3.bf16.msra.mxu0 %v2007_v50  ;;  %1569 = vmatpush3.bf16.msra.mxu1 %v2007_v50 }
  0x8b   :  { %1570 = vmatprep.subr.bf16.mxu0 %v1864_v0  ;;  %1594 = vmatprep.subr.bf16.mxu1 %v1864_v0 }
 0x140   :  { %v1141_v59 = vpop.f32.mrb[0].mxu0  ;;  %v303_v60 = vpop.f32.mrb[0].mxu1 }
 0x141   :  { %v181_v61 = vpop.f32.mrb[1].mxu0  ;;  %v1185_v62 = vpop.f32.mrb[1].mxu1  ;;  %v187_v11 = vadd.f32 %v1141_v59, %v2053_v58  ;;  %v830_v59 = vld [vmem:[#allocation9 + $0x68] sm:$0xff] }
 0x142   :  { %v182_v63 = vadd.f32 %v2053_v58, %v181_v61  ;;  %v831_v61 = vld [vmem:[#allocation9 + $0x70] sm:$0xff]  ;;  %v832_v62 = vld [vmem:[#allocation9 + $0x78] sm:$0xff] }
 0x144   :  { %v307_v2 = vadd.f32 %v303_v60, %v182_v63  ;;  %v1144_v4 = vpop.f32.mrb[2].mxu0  ;;  %v1709_v60 = vpack.c.bf16 %v830_v59, %v829_v57  ;;  %v1712_v63 = vpack.c.bf16 %v832_v62, %v831_v61 }
 0x145   :  { %v191_v5 = vpop.f32.mrb[3].mxu0  ;;  %v197_v23 = vadd.f32 %v1144_v4, %v2053_v58 }
 0x146   :  { %1724 = vtanh.f32 %v307_v2  ;;  %v192_v17 = vadd.f32 %v2053_v58, %v191_v5 }
 0x148   :  { %v2074_v6 = vpop.f32.mrb[4].mxu0 }
 0x149   :  { %v2076_v7 = vpop.f32.mrb[5].mxu0 }
 0x14a   :  { %v202_v29 = vadd.f32 %v2053_v58, %v2076_v7  ;;  %v929_v7 = vld [vmem:[%s2193_s5] ss:$0 sm:$0xff] }
 0x14c   :  { %v2078_v8 = vpop.f32.mrb[6].mxu0 }
 0x14d   :  { %v2080_v10 = vpop.f32.mrb[7].mxu0  ;;  %v217_v2 = vadd.f32 %v2078_v8, %v2053_v58 }
 0x14e   :  { %v212_v49 = vadd.f32 %v2053_v58, %v2080_v10 }
 0x150   :  { %v1725_v3 = vpop.eup %1724 }
 0x151   :  { %1219 = vmatmul.mubr.f32.vlgmr.msra.gmra.mrb[8].mxu0 %v1725_v3 }
 0x152   :  { %1572 = vmatpush3.bf16.msra.mxu0 %v1980_v9  ;;  %1288 = vmatprep.mubr.msk.f32.mxu0 %vm1865_vm0, %v1866_v1 }
 0x153   :  { %1573 = vmatprep.subr.bf16.mxu0 %v1864_v0 }
 0x156   :  { %1575 = vmatpush3.bf16.msra.mxu0 %v1983_v15 }
 0x157   :  { %1576 = vmatprep.subr.bf16.mxu0 %v1864_v0 }
 0x15a   :  { %1578 = vmatpush3.bf16.msra.mxu0 %v1987_v21 }
 0x15b   :  { %1579 = vmatprep.subr.bf16.mxu0 %v1864_v0 }
 0x15e   :  { %1581 = vmatpush3.bf16.msra.mxu0 %v1991_v28 }
 0x15f   :  { %1582 = vmatprep.subr.bf16.mxu0 %v1864_v0 }
 0x162   :  { %1584 = vmatpush3.bf16.msra.mxu0 %v1995_v34 }
 0x163   :  { %1585 = vmatprep.subr.bf16.mxu0 %v1864_v0 }
 0x166   :  { %1587 = vmatpush3.bf16.msra.mxu0 %v1999_v40 }
 0x167   :  { %1588 = vmatprep.subr.bf16.mxu0 %v1864_v0 }
 0x16a   :  { %1590 = vmatpush3.bf16.msra.mxu0 %v2003_v46 }
 0x16b   :  { %1591 = vmatprep.subr.bf16.mxu0 %v1864_v0 }
 0x16e   :  { %1593 = vmatpush3.bf16.msra.mxu0 %v2007_v50 }
 0x16f   :  { %1618 = vmatprep.subr.bf16.mxu0 %v1864_v0 }
 0x224   :  { %v375_v12 = vpop.f32.mrb[8].mxu0 }
 0x225   :  { %v379_v13 = vadd.f32 %v375_v12, %v187_v11  ;;  %v1220_v14 = vpop.f32.mrb[9].mxu0 }
 0x227   :  { %1726 = vtanh.f32 %v379_v13 }
 0x231   :  { %v1727_v16 = vpop.eup %1726 }
 0x232   :  { %1254 = vmatmul.mubr.f32.vlgmr.msra.gmra.mrb[2].mxu1 %v1727_v16 }
 0x233   :  { %1596 = vmatpush3.bf16.msra.mxu1 %v1980_v9  ;;  %1323 = vmatprep.mubr.msk.f32.mxu1 %vm1865_vm0, %v1866_v1 }
 0x234   :  { %1597 = vmatprep.subr.bf16.mxu1 %v1864_v0 }
 0x237   :  { %1599 = vmatpush3.bf16.msra.mxu1 %v1983_v15 }
 0x238   :  { %1600 = vmatprep.subr.bf16.mxu1 %v1864_v0 }
 0x23b   :  { %1602 = vmatpush3.bf16.msra.mxu1 %v1987_v21 }
 0x23c   :  { %1603 = vmatprep.subr.bf16.mxu1 %v1864_v0 }
 0x23f   :  { %1605 = vmatpush3.bf16.msra.mxu1 %v1991_v28 }
 0x240   :  { %1606 = vmatprep.subr.bf16.mxu1 %v1864_v0 }
 0x243   :  { %1608 = vmatpush3.bf16.msra.mxu1 %v1995_v34 }
 0x244   :  { %1609 = vmatprep.subr.bf16.mxu1 %v1864_v0 }
 0x247   :  { %1611 = vmatpush3.bf16.msra.mxu1 %v1999_v40 }
 0x248   :  { %1612 = vmatprep.subr.bf16.mxu1 %v1864_v0 }
 0x24b   :  { %1614 = vmatpush3.bf16.msra.mxu1 %v2003_v46 }
 0x24c   :  { %1615 = vmatprep.subr.bf16.mxu1 %v1864_v0 }
 0x24f   :  { %1617 = vmatpush3.bf16.msra.mxu1 %v2007_v50 }
 0x250   :  { %1642 = vmatprep.subr.bf16.mxu1 %v1864_v0 }
 0x305   :  { %v447_v18 = vpop.f32.mrb[2].mxu1 }
 0x306   :  { %v451_v19 = vadd.f32 %v447_v18, %v192_v17  ;;  %v1255_v20 = vpop.f32.mrb[3].mxu1 }
 0x308   :  { %1728 = vtanh.f32 %v451_v19 }
 0x312   :  { %v1729_v22 = vpop.eup %1728 }
 0x313   :  { %1289 = vmatmul.mubr.f32.vlgmr.msra.gmra.mrb[10].mxu0 %v1729_v22 }
 0x314   :  { %1620 = vmatpush3.bf16.msra.mxu0 %v1980_v9  ;;  %1358 = vmatprep.mubr.msk.f32.mxu0 %vm1865_vm0, %v1866_v1 }
 0x315   :  { %1621 = vmatprep.subr.bf16.mxu0 %v1864_v0 }
 0x318   :  { %1623 = vmatpush3.bf16.msra.mxu0 %v1983_v15 }
 0x319   :  { %1624 = vmatprep.subr.bf16.mxu0 %v1864_v0 }
 0x31c   :  { %1626 = vmatpush3.bf16.msra.mxu0 %v1987_v21 }
 0x31d   :  { %1627 = vmatprep.subr.bf16.mxu0 %v1864_v0 }
 0x320   :  { %1629 = vmatpush3.bf16.msra.mxu0 %v1991_v28 }
 0x321   :  { %1630 = vmatprep.subr.bf16.mxu0 %v1864_v0 }
 0x324   :  { %1632 = vmatpush3.bf16.msra.mxu0 %v1995_v34 }
 0x325   :  { %1633 = vmatprep.subr.bf16.mxu0 %v1864_v0 }
 0x328   :  { %1635 = vmatpush3.bf16.msra.mxu0 %v1999_v40 }
 0x329   :  { %1636 = vmatprep.subr.bf16.mxu0 %v1864_v0 }
 0x32c   :  { %1638 = vmatpush3.bf16.msra.mxu0 %v2003_v46 }
 0x32d   :  { %1639 = vmatprep.subr.bf16.mxu0 %v1864_v0 }
 0x330   :  { %1641 = vmatpush3.bf16.msra.mxu0 %v2007_v50 }
 0x331   :  { %1666 = vmatprep.subr.bf16.mxu0 %v1864_v0 }
 0x3e6   :  { %v519_v24 = vpop.f32.mrb[10].mxu0 }
 0x3e7   :  { %v523_v25 = vadd.f32 %v519_v24, %v197_v23  ;;  %v1290_v26 = vpop.f32.mrb[11].mxu0 }
 0x3e9   :  { %1730 = vtanh.f32 %v523_v25 }
 0x3f3   :  { %v1731_v27 = vpop.eup %1730 }
 0x3f4   :  { %1324 = vmatmul.mubr.f32.vlgmr.msra.gmra.mrb[4].mxu1 %v1731_v27 }
 0x3f5   :  { %1644 = vmatpush3.bf16.msra.mxu1 %v1980_v9  ;;  %1393 = vmatprep.mubr.msk.f32.mxu1 %vm1865_vm0, %v1866_v1 }
 0x3f6   :  { %1645 = vmatprep.subr.bf16.mxu1 %v1864_v0 }
 0x3f9   :  { %1647 = vmatpush3.bf16.msra.mxu1 %v1983_v15 }
 0x3fa   :  { %1648 = vmatprep.subr.bf16.mxu1 %v1864_v0 }
 0x3fd   :  { %1650 = vmatpush3.bf16.msra.mxu1 %v1987_v21 }
 0x3fe   :  { %1651 = vmatprep.subr.bf16.mxu1 %v1864_v0 }
 0x401   :  { %1653 = vmatpush3.bf16.msra.mxu1 %v1991_v28 }
 0x402   :  { %1654 = vmatprep.subr.bf16.mxu1 %v1864_v0 }
 0x405   :  { %1656 = vmatpush3.bf16.msra.mxu1 %v1995_v34 }
 0x406   :  { %1657 = vmatprep.subr.bf16.mxu1 %v1864_v0 }
 0x409   :  { %1659 = vmatpush3.bf16.msra.mxu1 %v1999_v40 }
 0x40a   :  { %1660 = vmatprep.subr.bf16.mxu1 %v1864_v0 }
 0x40d   :  { %1662 = vmatpush3.bf16.msra.mxu1 %v2003_v46 }
 0x40e   :  { %1663 = vmatprep.subr.bf16.mxu1 %v1864_v0 }
 0x411   :  { %1665 = vmatpush3.bf16.msra.mxu1 %v2007_v50 }
 0x412   :  { %1690 = vmatprep.subr.bf16.mxu1 %v1864_v0 }
 0x4c7   :  { %v591_v30 = vpop.f32.mrb[4].mxu1 }
 0x4c8   :  { %v595_v31 = vadd.f32 %v591_v30, %v202_v29  ;;  %v1325_v32 = vpop.f32.mrb[5].mxu1 }
 0x4ca   :  { %1732 = vtanh.f32 %v595_v31 }
 0x4d4   :  { %v1733_v33 = vpop.eup %1732 }
 0x4d5   :  { %1359 = vmatmul.mubr.f32.vlgmr.msra.gmra.mrb[12].mxu0 %v1733_v33 }
 0x4d6   :  { %1668 = vmatpush3.bf16.msra.mxu0 %v1980_v9  ;;  %1428 = vmatprep.mubr.msk.f32.mxu0 %vm1865_vm0, %v1866_v1  ;;  %v207_v9 = vadd.f32 %v2074_v6, %v2053_v58 }
 0x4d7   :  { %1669 = vmatprep.subr.bf16.mxu0 %v1864_v0 }
 0x4da   :  { %1671 = vmatpush3.bf16.msra.mxu0 %v1983_v15 }
 0x4db   :  { %1672 = vmatprep.subr.bf16.mxu0 %v1864_v0 }
 0x4de   :  { %1674 = vmatpush3.bf16.msra.mxu0 %v1987_v21 }
 0x4df   :  { %1675 = vmatprep.subr.bf16.mxu0 %v1864_v0 }
 0x4e2   :  { %1677 = vmatpush3.bf16.msra.mxu0 %v1991_v28 }
 0x4e3   :  { %1678 = vmatprep.subr.bf16.mxu0 %v1864_v0 }
 0x4e6   :  { %1680 = vmatpush3.bf16.msra.mxu0 %v1995_v34 }
 0x4e7   :  { %1681 = vmatprep.subr.bf16.mxu0 %v1864_v0 }
 0x4ea   :  { %1683 = vmatpush3.bf16.msra.mxu0 %v1999_v40  ;;  %v1694_v40 = vpack.c.bf16 %v820_v39, %v819_v37 }
 0x4eb   :  { %1684 = vmatprep.subr.bf16.mxu0 %v1864_v0 }
 0x4ee   :  { %1686 = vmatpush3.bf16.msra.mxu0 %v2003_v46  ;;  %v1700_v46 = vpack.c.bf16 %v824_v45, %v823_v44 }
 0x4ef   :  { %1687 = vmatprep.subr.bf16.mxu0 %v1864_v0 }
 0x4f2   :  { %1689 = vmatpush3.bf16.msra.mxu0 %v2007_v50 }
 0x5a8   :  { %v663_v15 = vpop.f32.mrb[12].mxu0 }
 0x5a9   :  { %v667_v21 = vadd.f32 %v663_v15, %v207_v9  ;;  %v1360_v28 = vpop.f32.mrb[13].mxu0 }
 0x5ab   :  { %1734 = vtanh.f32 %v667_v21 }
 0x5b5   :  { %v1735_v34 = vpop.eup %1734 }
 0x5b6   :  { %1394 = vmatmul.mubr.f32.vlgmr.msra.gmra.mrb[6].mxu1 %v1735_v34 }
 0x5b7   :  { %1463 = vmatprep.mubr.msk.f32.mxu1 %vm1865_vm0, %v1866_v1  ;;  %1692 = vmatpush3.bf16.msra.mxu1 %v1691_v38  ;;  %v825_v1 = vld [vmem:[#allocation9 + $0x40] sm:$0xff] }
 0x5b8   :  { %1693 = vmatprep.subr.bf16.mxu1 %v1864_v0  ;;  %v1703_v48 = vpack.c.bf16 %v826_v47, %v825_v1 }
 0x5bb   :  { %1695 = vmatpush3.bf16.msra.mxu1 %v1694_v40 }
 0x5bc   :  { %1696 = vmatprep.subr.bf16.mxu1 %v1864_v0 }
 0x5bf   :  { %1698 = vmatpush3.bf16.msra.mxu1 %v1697_v43 }
 0x5c0   :  { %1699 = vmatprep.subr.bf16.mxu1 %v1864_v0 }
 0x5c3   :  { %1701 = vmatpush3.bf16.msra.mxu1 %v1700_v46 }
 0x5c4   :  { %1702 = vmatprep.subr.bf16.mxu1 %v1864_v0 }
 0x5c7   :  { %1704 = vmatpush3.bf16.msra.mxu1 %v1703_v48 }
 0x5c8   :  { %1705 = vmatprep.subr.bf16.mxu1 %v1864_v0 }
 0x5cb   :  { %1707 = vmatpush3.bf16.msra.mxu1 %v1706_v56 }
 0x5cc   :  { %1708 = vmatprep.subr.bf16.mxu1 %v1864_v0 }
 0x5cf   :  { %1710 = vmatpush3.bf16.msra.mxu1 %v1709_v60 }
 0x5d0   :  { %1711 = vmatprep.subr.bf16.mxu1 %v1864_v0 }
 0x5d3   :  { %1713 = vmatpush3.bf16.msra.mxu1 %v1712_v63 }
 0x689   :  { %v735_v50 = vpop.f32.mrb[6].mxu1 }
 0x68a   :  { %v739_v51 = vadd.f32 %v735_v50, %v212_v49  ;;  %v1395_v52 = vpop.f32.mrb[7].mxu1 }
 0x68c   :  { %1736 = vtanh.f32 %v739_v51 }
 0x696   :  { %v1737_v53 = vpop.eup %1736 }
 0x697   :  { %1429 = vmatmul.mubr.f32.vlgmr.msra.gmra.mrb[14].mxu0 %v1737_v53 }
 0x76a   :  { %v807_v3 = vpop.f32.mrb[14].mxu0 }
 0x76b   :  { %v811_v4 = vadd.f32 %v807_v3, %v217_v2  ;;  %v1430_v5 = vpop.f32.mrb[15].mxu0 }
 0x76d   :  { %1738 = vtanh.f32 %v811_v4 }
 0x777   :  { %v1739_v6 = vpop.eup %1738 }
 0x778   :  { %1464 = vmatmul.mubr.f32.vlgmr.msra.gmra.mrb[8].mxu1 %v1739_v6 }
 0x84b   :  { %v906_v10 = vpop.f32.mrb[8].mxu1 }
 0x84c   :  { %v907_v11 = vadd.f32 %v929_v7, %v906_v10  ;;  %v1465_v12 = vpop.f32.mrb[9].mxu1 }
 0x84e   :  { %910 = vst [vmem:[#allocation11] sm:$0xff] %v907_v11 }
 0x84f   :  { %1839 = shalt.err (!%p1836_p8)
}
 0x850   :  { %s1840_s27 = scalar_lea.hbm %s2194_s6, 128 }
 0x851   :  { %p1841_p9 = scmp.ne.s32.totalorder %s2194_s6, %s1840_s27  ;;  %p1844_p10 = scmp.lt.u32.totalorder %s1840_s27, %s2194_s6 }
 0x853   :  { %p1846_p11 = pnand %p1844_p10, %p1841_p9 }
 0x855   :  { %1849 = shalt.err (!%p1846_p11)
}
 0x856   :  { %920 = dma.vmem_to_hbm [thread:$0]  %s918_s22, 128, %s2194_s6, [#allocation5]  }
 0x857   :  { %1856 = dma.done.wait [#allocation5], 128  }
 0x858   :  { %1857 = vsyncadd [#allocation5], 4294967168 }
 0x859   :  { %924 = vsyncpa [#allocation4], 1 }
 0x85a   :  { %925 = vsyncpa [#allocation7], 1 }
 0x85b   :  { %926 = vsyncpa [#allocation10], 1 }
 0x85c   :  { %927 = vsyncpa [#allocation5], 1 }

</bundles_post_ra>
